<compile_context>
chip_gen: v6e
topology: v6e:2x2x1
jax: 0.10.0
libtpu: 0.0.40
codegen_flags: <defaults>
</compile_context>

<pallas_src>
import jax
import jax.numpy as jnp
from jax.experimental import pallas as pl
from jax.experimental.pallas import tpu as pltpu


_VMEM_LIMIT_BYTES = 32 * 1024 * 1024   # well above per-step usage, < v7x's 64 MiB


def _round_up(x, m):
    return (x + m - 1) // m * m


def _choose_hw_tile(hw, max_tile=1024):
    # Prefer a divisor of HW (padding-free pipeline). Tile must be a multiple of 128
    # (lane width) unless it covers the whole dim.
    if hw <= max_tile:
        return hw, hw
    for t in range(max_tile - max_tile % 128, 127, -128):
        if hw % t == 0:
            return t, hw
    return max_tile, _round_up(hw, max_tile)


def _pick_row_tile(total, max_tile=128):
    if total <= max_tile:
        return total
    for t in range(max_tile, 7, -1):
        if total % t == 0 and t % 8 == 0:
            return t
    return total


# ----------------------------------------------------------------------------
# Kernel 1: fused encoder (conv-as-matmul + folded BN + ReLU) + decoder (1x1)
# Channels-first: HW is the lane dimension everywhere.
# ----------------------------------------------------------------------------
def seg_head_kernel(p_ref, w1_ref, b1_ref, w2_ref, b2_ref, o_ref):
    # p_ref : (K1, TILE_HW)    bf16  channels-first im2col patches
    # w1_ref: (Cmid, K1)       bf16  3x3 conv weights, transposed, BN scale folded in
    # b1_ref: (Cmid, 1)        f32   folded BN bias (broadcast along lanes)
    # w2_ref: (NCp8, Cmid)     bf16  1x1 classifier weights, transposed, padded to 8
    # b2_ref: (NCp8, 1)        f32   classifier bias, padded
    # o_ref : (NCp8, TILE_HW)  bf16  channels-first, lane-dense logits tile
    h = jnp.dot(w1_ref[...], p_ref[...], preferred_element_type=jnp.float32)
    h = jnp.maximum(h + b1_ref[...], 0.0).astype(jnp.bfloat16)
    logits = jnp.dot(w2_ref[...], h, preferred_element_type=jnp.float32) + b2_ref[...]
    o_ref[...] = logits.astype(o_ref.dtype)


def seg_head(patches, w1t, b1t, w2t, b2t, tile_hw):
    # patches: (N, K1, HWp) bf16 -> logits (N, NCp8, HWp) bf16
    n, k1, hwp = patches.shape
    cmid = w1t.shape[0]
    ncp8 = w2t.shape[0]
    grid = (n, hwp // tile_hw)

    flops = int(2 * n * hwp * (k1 * cmid + cmid * ncp8))
    bytes_accessed = int(patches.size * 2 + n * ncp8 * hwp * 2
                         + (w1t.size + w2t.size) * 2 + (b1t.size + b2t.size) * 4)

    return pl.pallas_call(
        seg_head_kernel,
        out_shape=jax.ShapeDtypeStruct((n, ncp8, hwp), jnp.bfloat16),
        grid_spec=pltpu.PrefetchScalarGridSpec(
            num_scalar_prefetch=0,
            grid=grid,
            in_specs=[
                pl.BlockSpec((pl.Squeezed(), k1, tile_hw), lambda i, t: (i, 0, t)),
                pl.BlockSpec((cmid, k1), lambda i, t: (0, 0)),
                pl.BlockSpec((cmid, 1), lambda i, t: (0, 0)),
                pl.BlockSpec((ncp8, cmid), lambda i, t: (0, 0)),
                pl.BlockSpec((ncp8, 1), lambda i, t: (0, 0)),
            ],
            out_specs=pl.BlockSpec((pl.Squeezed(), ncp8, tile_hw),
                                   lambda i, t: (i, 0, t)),
        ),
        compiler_params=pltpu.CompilerParams(
            dimension_semantics=("parallel", "parallel"),
            vmem_limit_bytes=_VMEM_LIMIT_BYTES,
        ),
        cost_estimate=pl.CostEstimate(flops=flops, transcendentals=0,
                                      bytes_accessed=bytes_accessed),
    )(patches, w1t, b1t, w2t, b2t)


# ----------------------------------------------------------------------------
# Kernel 2: bilinear upsample (align_corners=True), NCHW in / NCHW out.
# Per (batch, channel, row-tile): Y = A_h_tile @ X @ A_w^T  (two 2D MXU matmuls,
# Wout lane-dense, no channel padding, no batched dot_general, no transposes).
# ----------------------------------------------------------------------------
def upsample_kernel(x_ref, ah_ref, awt_ref, o_ref):
    # x_ref  : (Ho, Wo)        bf16  one channel of the logits feature map
    # ah_ref : (TILE_H, Ho)    bf16  rows of the H-interpolation matrix
    # awt_ref: (Wo, Wout)      bf16  transposed W-interpolation matrix
    # o_ref  : (TILE_H, Wout)  f32   NCHW output tile (W in lanes -> dense stores)
    t = jnp.dot(ah_ref[...], x_ref[...], preferred_element_type=jnp.float32)
    t = t.astype(jnp.bfloat16)
    o_ref[...] = jnp.dot(t, awt_ref[...], preferred_element_type=jnp.float32)


def bilinear_upsample(logits_cf, a_h, a_wt, nc):
    # logits_cf: (N, NCp8, Ho, Wo) bf16 -> (N, NC, Hout, Wout) f32 (NCHW, no transpose)
    n, _, ho, wo = logits_cf.shape
    hout = a_h.shape[0]
    wout = a_wt.shape[1]
    tile_h = _pick_row_tile(hout)
    n_h_tiles = hout // tile_h
    grid = (n, nc, n_h_tiles)     # padded channels (if any) are simply never read

    flops = int(2 * n * nc * (hout * ho * wo + hout * wo * wout))
    bytes_accessed = int(n * nc * ho * wo * 2 * n_h_tiles
                         + n * nc * hout * wout * 4
                         + (a_h.size + a_wt.size) * 2)

    return pl.pallas_call(
        upsample_kernel,
        # TODO(synk): emit bf16 here if downstream tolerates it (halves the largest
        # HBM write); kept f32 to match the module's output dtype.
        out_shape=jax.ShapeDtypeStruct((n, nc, hout, wout), jnp.float32),
        grid_spec=pltpu.PrefetchScalarGridSpec(
            num_scalar_prefetch=0,
            grid=grid,
            in_specs=[
                pl.BlockSpec((pl.Squeezed(), pl.Squeezed(), ho, wo),
                             lambda i, c, t: (i, c, 0, 0)),
                pl.BlockSpec((tile_h, ho), lambda i, c, t: (t, 0)),
                pl.BlockSpec((wo, wout), lambda i, c, t: (0, 0)),
            ],
            out_specs=pl.BlockSpec((pl.Squeezed(), pl.Squeezed(), tile_h, wout),
                                   lambda i, c, t: (i, c, t, 0)),
        ),
        compiler_params=pltpu.CompilerParams(
            dimension_semantics=("parallel", "parallel", "parallel"),
            vmem_limit_bytes=_VMEM_LIMIT_BYTES,
        ),
        cost_estimate=pl.CostEstimate(flops=flops, transcendentals=0,
                                      bytes_accessed=bytes_accessed),
    )(logits_cf, a_h, a_wt)


# ----------------------------------------------------------------------------
# Glue: channels-first im2col, interpolation matrices, params, forward wrapper
# ----------------------------------------------------------------------------
def im2col_3x3_s2_cf(x_nchw):
    # (N, Cin, H, W) -> (N, 9*Cin, Ho*Wo), pad=1, stride=2; K index = kh*3*Cin+kw*Cin+c
    n, cin, h, w = x_nchw.shape
    ho = (h + 2 - 3) // 2 + 1
    wo = (w + 2 - 3) // 2 + 1
    xp = jnp.pad(x_nchw, ((0, 0), (0, 0), (1, 1), (1, 1)))
    chunks = []
    for kh in range(3):
        for kw in range(3):
            chunks.append(xp[:, :, kh:kh + 2 * ho:2, kw:kw + 2 * wo:2])
    patches = jnp.concatenate(chunks, axis=1)            # (N, 9*Cin, Ho, Wo)
    return patches.reshape(n, 9 * cin, ho * wo), ho, wo


def bilinear_matrix(out_size, in_size):
    # align_corners=True interpolation matrix (out_size, in_size), f32
    dst = jnp.arange(out_size, dtype=jnp.float32)
    if out_size == 1:
        src = jnp.zeros_like(dst)
    else:
        src = dst * (in_size - 1) / (out_size - 1)
    i0 = jnp.clip(jnp.floor(src), 0, in_size - 1).astype(jnp.int32)
    i1 = jnp.clip(i0 + 1, 0, in_size - 1)
    frac = src - i0.astype(jnp.float32)
    a = jnp.zeros((out_size, in_size), dtype=jnp.float32)
    a = a.at[jnp.arange(out_size), i0].add(1.0 - frac)
    a = a.at[jnp.arange(out_size), i1].add(frac)
    return a


def model_builder_forward(x_nchw, params):
    # x_nchw: (N, Cin, H, W) f32 -> (N, num_classes, H, W) f32 (NCHW, no final transpose)
    n, cin, h, w = x_nchw.shape

    # bf16 channels-first im2col straight from NCHW (no NHWC pass, half the patch bytes)
    patches, ho, wo = im2col_3x3_s2_cf(x_nchw.astype(jnp.bfloat16))   # (N, K1, HW)
    hw = ho * wo
    tile_hw, hwp = _choose_hw_tile(hw)
    if hwp != hw:
        patches = jnp.pad(patches, ((0, 0), (0, 0), (0, hwp - hw)))

    cmid = params["w1"].shape[1]
    nc = params["w2"].shape[1]
    ncp8 = _round_up(nc, 8)

    # Fold BN scale into conv weights on the host; transpose for channels-first matmuls.
    w1t = (params["w1"] * params["bn_scale"]).T.astype(jnp.bfloat16)   # (Cmid, K1)
    b1t = params["bn_bias"].T.astype(jnp.float32)                      # (Cmid, 1)
    w2t = jnp.zeros((ncp8, cmid), jnp.bfloat16).at[:nc].set(
        params["w2"].T.astype(jnp.bfloat16))                           # (NCp8, Cmid)
    b2t = jnp.zeros((ncp8, 1), jnp.float32).at[:nc, 0].set(params["b2"][0])

    logits = seg_head(patches, w1t, b1t, w2t, b2t, tile_hw)    # (N, NCp8, HWp) bf16
    if hwp != hw:
        logits = logits[:, :, :hw]       # fallback path only; padded rows never reach upsample
    logits_cf = logits.reshape(n, ncp8, ho, wo)                # free row-major reshape

    # Interp matrices in bf16 (matches MXU operand dtype; ~0.4% coeff quantization).
    a_h = bilinear_matrix(h, ho).astype(jnp.bfloat16)          # (H, Ho)
    a_wt = bilinear_matrix(w, wo).T.astype(jnp.bfloat16)       # (Wo, W), consumed orientation

    return bilinear_upsample(logits_cf, a_h, a_wt, nc)         # (N, NC, H, W) f32


def init_params(key, cin, cmid, num_classes):
    k1, k2, k3, k4 = jax.random.split(key, 4)
    w1 = jax.random.normal(k1, (9 * cin, cmid), jnp.float32) * 0.1
    w2 = jax.random.normal(k2, (cmid, num_classes), jnp.float32) * 0.1
    bn_scale = 1.0 + 0.05 * jax.random.normal(k3, (1, cmid), jnp.float32)
    bn_bias = 0.05 * jax.random.normal(k4, (1, cmid), jnp.float32)
    b2 = jnp.zeros((1, num_classes), jnp.float32)
    return {"w1": w1, "w2": w2, "bn_scale": bn_scale, "bn_bias": bn_bias, "b2": b2}


def reference_forward(x_nchw, params):
    # Pure-JAX f32 reference of the same synthetic ModelBuilder forward.
    n, cin, h, w = x_nchw.shape
    x_nhwc = jnp.transpose(x_nchw, (0, 2, 3, 1))
    w_hwio = params["w1"].reshape(3, 3, cin, -1)
    feat = jax.lax.conv_general_dilated(
        x_nhwc, w_hwio, window_strides=(2, 2), padding=((1, 1), (1, 1)),
        dimension_numbers=("NHWC", "HWIO", "NHWC"))
    feat = feat * params["bn_scale"][0] + params["bn_bias"][0]
    feat = jnp.maximum(feat, 0.0)
    logits = feat @ params["w2"] + params["b2"][0]             # (N, Ho, Wo, NC)
    ho, wo = logits.shape[1], logits.shape[2]
    a_h = bilinear_matrix(h, ho)
    a_w = bilinear_matrix(w, wo)
    up = jnp.einsum("Hh,nhwc->nHwc", a_h, logits)
    up = jnp.einsum("Ww,nhwc->nhWc", a_w, up)
    return jnp.transpose(up, (0, 3, 1, 2))


if __name__ == "__main__":
    N, Cin, H, W = 2, 4, 16, 16
    Cmid, num_classes = 32, 8

    key = jax.random.PRNGKey(0)
    kx, kp = jax.random.split(key)
    x = jax.random.normal(kx, (N, Cin, H, W), jnp.float32)
    params = init_params(kp, Cin, Cmid, num_classes)

    out = jax.jit(model_builder_forward)(x, params)
    out = jax.block_until_ready(out)

    assert out.shape == (N, num_classes, H, W), out.shape
    assert bool(jnp.all(jnp.isfinite(out)))

    # Loose tolerance: kernels run bf16 operands with f32 accumulation.
    ref = jax.jit(reference_forward)(x, params)
    err = float(jnp.max(jnp.abs(out - ref)))
    assert err < 0.15, err

    print("KERNEL_OK")
</pallas_src>

<mosaic_0001>
module attributes {stable_mosaic.version = 11 : i64} {
  func.func private @main(%arg0: i32) attributes {dimension_semantics = [#tpu.dimension_semantics<core_parallel>], iteration_bounds = array<i64: 2>, tpu.core_type = #tpu.core_type<sc_scalar_subcore>, window_params = []} {
    return
  }
}

module attributes {stable_mosaic.version = 11 : i64} {
  func.func private @main(%arg0: i32) attributes {dimension_semantics = [#tpu.dimension_semantics<core_parallel>], iteration_bounds = array<i64: 2>, tpu.core_type = #tpu.core_type<sc_scalar_subcore>, window_params = []} {
    return
  }
}

module attributes {stable_mosaic.version = 11 : i64} {
  func.func @upsample_kernel(%arg0: i32, %arg1: i32, %arg2: i32, %arg3: memref<1x1x8x8xbf16, #tpu.memory_space<vmem>>, %arg4: memref<16x8xbf16, #tpu.memory_space<vmem>>, %arg5: memref<8x16xbf16, #tpu.memory_space<vmem>>, %arg6: memref<1x1x16x16xf32, #tpu.memory_space<vmem>>) attributes {dimension_semantics = [#tpu.dimension_semantics<parallel>, #tpu.dimension_semantics<parallel>, #tpu.dimension_semantics<parallel>], iteration_bounds = array<i64: 2, 8, 1>, scalar_prefetch = 0 : i64, scratch_operands = 0 : i64, tpu.core_type = #tpu.core_type<tc>, window_params = [{transform_indices = @transform_0, window_bounds = array<i64: 1, 1, 8, 8>}, {transform_indices = @transform_1, window_bounds = array<i64: 16, 8>}, {pipeline_mode = #tpu.pipeline_mode<synchronous>, transform_indices = @transform_2, window_bounds = array<i64: 8, 16>}, {transform_indices = @transform_3, window_bounds = array<i64: 1, 1, 16, 16>}]} {
    %c0 = arith.constant 0 : index
    %c0_0 = arith.constant 0 : index
    %0 = vector.load %arg4[%c0, %c0_0] : memref<16x8xbf16, #tpu.memory_space<vmem>>, vector<16x8xbf16>
    %c0_1 = arith.constant 0 : index
    %c0_2 = arith.constant 0 : index
    %c0_3 = arith.constant 0 : index
    %c0_4 = arith.constant 0 : index
    %1 = vector.load %arg3[%c0_1, %c0_2, %c0_3, %c0_4] : memref<1x1x8x8xbf16, #tpu.memory_space<vmem>>, vector<1x1x8x8xbf16>
    %2 = vector.shape_cast %1 : vector<1x1x8x8xbf16> to vector<8x8xbf16>
    %cst = arith.constant dense<0.000000e+00> : vector<16x8xf32>
    %3 = tpu.matmul %0, %2, %cst {dimension_numbers = #tpu.dot_dimension_numbers<[1], [0], [0], [1], [0, 0, 1, 1], [], []>} : vector<16x8xbf16>, vector<8x8xbf16>, vector<16x8xf32> -> vector<16x8xf32>
    %4 = arith.truncf %3 : vector<16x8xf32> to vector<16x8xbf16>
    %c0_5 = arith.constant 0 : index
    %c0_6 = arith.constant 0 : index
    %5 = vector.load %arg5[%c0_5, %c0_6] : memref<8x16xbf16, #tpu.memory_space<vmem>>, vector<8x16xbf16>
    %cst_7 = arith.constant dense<0.000000e+00> : vector<16x16xf32>
    %6 = tpu.matmul %4, %5, %cst_7 {dimension_numbers = #tpu.dot_dimension_numbers<[1], [0], [0], [1], [0, 0, 1, 1], [], []>} : vector<16x8xbf16>, vector<8x16xbf16>, vector<16x16xf32> -> vector<16x16xf32>
    %c0_8 = arith.constant 0 : index
    %c0_9 = arith.constant 0 : index
    %c0_10 = arith.constant 0 : index
    %c0_11 = arith.constant 0 : index
    %7 = vector.load %arg6[%c0_8, %c0_9, %c0_10, %c0_11] : memref<1x1x16x16xf32, #tpu.memory_space<vmem>>, vector<1x1x16x16xf32>
    %8 = vector.shape_cast %7 : vector<1x1x16x16xf32> to vector<16x16xf32>
    %9 = vector.shape_cast %6 : vector<16x16xf32> to vector<1x1x16x16xf32>
    tpu.vector_store %arg6[%c0_8, %c0_9, %c0_10, %c0_11], %9 {strides = array<i32>} : memref<1x1x16x16xf32, #tpu.memory_space<vmem>>, vector<1x1x16x16xf32>,
    return
  }
  func.func @transform_0(%arg0: i32, %arg1: i32, %arg2: i32) -> (i32, i32, i32, i32) {
    %c0_i32 = arith.constant 0 : i32
    %c0_i32_0 = arith.constant 0 : i32
    %c0_i32_1 = arith.constant 0 : i32
    return %arg0, %arg1, %c0_i32, %c0_i32_0 : i32, i32, i32, i32
  }
  func.func @transform_1(%arg0: i32, %arg1: i32, %arg2: i32) -> (i32, i32) {
    %c0_i32 = arith.constant 0 : i32
    %c0_i32_0 = arith.constant 0 : i32
    return %arg2, %c0_i32 : i32, i32
  }
  func.func @transform_2(%arg0: i32, %arg1: i32, %arg2: i32) -> (i32, i32) {
    %c0_i32 = arith.constant 0 : i32
    %c0_i32_0 = arith.constant 0 : i32
    %c0_i32_1 = arith.constant 0 : i32
    return %c0_i32, %c0_i32_0 : i32, i32
  }
  func.func @transform_3(%arg0: i32, %arg1: i32, %arg2: i32) -> (i32, i32, i32, i32) {
    %c0_i32 = arith.constant 0 : i32
    %c0_i32_0 = arith.constant 0 : i32
    return %arg0, %arg1, %arg2, %c0_i32 : i32, i32, i32, i32
  }
}

module attributes {stable_mosaic.version = 11 : i64} {
  func.func @seg_head_kernel(%arg0: i32, %arg1: i32, %arg2: memref<1x36x64xbf16, #tpu.memory_space<vmem>>, %arg3: memref<32x36xbf16, #tpu.memory_space<vmem>>, %arg4: memref<32x1xf32, #tpu.memory_space<vmem>>, %arg5: memref<8x32xbf16, #tpu.memory_space<vmem>>, %arg6: memref<8x1xf32, #tpu.memory_space<vmem>>, %arg7: memref<1x8x64xbf16, #tpu.memory_space<vmem>>) attributes {dimension_semantics = [#tpu.dimension_semantics<parallel>, #tpu.dimension_semantics<parallel>], iteration_bounds = array<i64: 2, 1>, scalar_prefetch = 0 : i64, scratch_operands = 0 : i64, tpu.core_type = #tpu.core_type<tc>, window_params = [{transform_indices = @transform_0, window_bounds = array<i64: 1, 36, 64>}, {pipeline_mode = #tpu.pipeline_mode<synchronous>, transform_indices = @transform_1, window_bounds = array<i64: 32, 36>}, {pipeline_mode = #tpu.pipeline_mode<synchronous>, transform_indices = @transform_2, window_bounds = array<i64: 32, 1>}, {pipeline_mode = #tpu.pipeline_mode<synchronous>, transform_indices = @transform_3, window_bounds = array<i64: 8, 32>}, {pipeline_mode = #tpu.pipeline_mode<synchronous>, transform_indices = @transform_4, window_bounds = array<i64: 8, 1>}, {transform_indices = @transform_5, window_bounds = array<i64: 1, 8, 64>}]} {
    %c0 = arith.constant 0 : index
    %c0_0 = arith.constant 0 : index
    %0 = vector.load %arg3[%c0, %c0_0] : memref<32x36xbf16, #tpu.memory_space<vmem>>, vector<32x36xbf16>
    %c0_1 = arith.constant 0 : index
    %c0_2 = arith.constant 0 : index
    %c0_3 = arith.constant 0 : index
    %1 = vector.load %arg2[%c0_1, %c0_2, %c0_3] : memref<1x36x64xbf16, #tpu.memory_space<vmem>>, vector<1x36x64xbf16>
    %2 = vector.shape_cast %1 : vector<1x36x64xbf16> to vector<36x64xbf16>
    %cst = arith.constant dense<0.000000e+00> : vector<32x64xf32>
    %3 = tpu.matmul %0, %2, %cst {dimension_numbers = #tpu.dot_dimension_numbers<[1], [0], [0], [1], [0, 0, 1, 1], [], []>} : vector<32x36xbf16>, vector<36x64xbf16>, vector<32x64xf32> -> vector<32x64xf32>
    %c0_4 = arith.constant 0 : index
    %c0_5 = arith.constant 0 : index
    %4 = vector.load %arg4[%c0_4, %c0_5] : memref<32x1xf32, #tpu.memory_space<vmem>>, vector<32x1xf32>
    %5 = vector.broadcast %4 : vector<32x1xf32> to vector<32x64xf32>
    %6 = arith.addf %3, %5 : vector<32x64xf32>
    %cst_6 = arith.constant 0.000000e+00 : f32
    %7 = vector.broadcast %cst_6 : f32 to vector<32x64xf32>
    %8 = arith.maximumf %6, %7 : vector<32x64xf32>
    %9 = arith.truncf %8 : vector<32x64xf32> to vector<32x64xbf16>
    %c0_7 = arith.constant 0 : index
    %c0_8 = arith.constant 0 : index
    %10 = vector.load %arg5[%c0_7, %c0_8] : memref<8x32xbf16, #tpu.memory_space<vmem>>, vector<8x32xbf16>
    %cst_9 = arith.constant dense<0.000000e+00> : vector<8x64xf32>
    %11 = tpu.matmul %10, %9, %cst_9 {dimension_numbers = #tpu.dot_dimension_numbers<[1], [0], [0], [1], [0, 0, 1, 1], [], []>} : vector<8x32xbf16>, vector<32x64xbf16>, vector<8x64xf32> -> vector<8x64xf32>
    %c0_10 = arith.constant 0 : index
    %c0_11 = arith.constant 0 : index
    %12 = vector.load %arg6[%c0_10, %c0_11] : memref<8x1xf32, #tpu.memory_space<vmem>>, vector<8x1xf32>
    %13 = vector.broadcast %12 : vector<8x1xf32> to vector<8x64xf32>
    %14 = arith.addf %11, %13 : vector<8x64xf32>
    %15 = arith.truncf %14 : vector<8x64xf32> to vector<8x64xbf16>
    %c0_12 = arith.constant 0 : index
    %c0_13 = arith.constant 0 : index
    %c0_14 = arith.constant 0 : index
    %16 = vector.load %arg7[%c0_12, %c0_13, %c0_14] : memref<1x8x64xbf16, #tpu.memory_space<vmem>>, vector<1x8x64xbf16>
    %17 = vector.shape_cast %16 : vector<1x8x64xbf16> to vector<8x64xbf16>
    %18 = vector.shape_cast %15 : vector<8x64xbf16> to vector<1x8x64xbf16>
    tpu.vector_store %arg7[%c0_12, %c0_13, %c0_14], %18 {strides = array<i32>} : memref<1x8x64xbf16, #tpu.memory_space<vmem>>, vector<1x8x64xbf16>,
    return
  }
  func.func @transform_0(%arg0: i32, %arg1: i32) -> (i32, i32, i32) {
    %c0_i32 = arith.constant 0 : i32
    %c0_i32_0 = arith.constant 0 : i32
    return %arg0, %c0_i32, %arg1 : i32, i32, i32
  }
  func.func @transform_1(%arg0: i32, %arg1: i32) -> (i32, i32) {
    %c0_i32 = arith.constant 0 : i32
    %c0_i32_0 = arith.constant 0 : i32
    %c0_i32_1 = arith.constant 0 : i32
    return %c0_i32, %c0_i32_0 : i32, i32
  }
  func.func @transform_2(%arg0: i32, %arg1: i32) -> (i32, i32) {
    %c0_i32 = arith.constant 0 : i32
    %c0_i32_0 = arith.constant 0 : i32
    %c0_i32_1 = arith.constant 0 : i32
    return %c0_i32, %c0_i32_0 : i32, i32
  }
  func.func @transform_3(%arg0: i32, %arg1: i32) -> (i32, i32) {
    %c0_i32 = arith.constant 0 : i32
    %c0_i32_0 = arith.constant 0 : i32
    %c0_i32_1 = arith.constant 0 : i32
    return %c0_i32, %c0_i32_0 : i32, i32
  }
  func.func @transform_4(%arg0: i32, %arg1: i32) -> (i32, i32) {
    %c0_i32 = arith.constant 0 : i32
    %c0_i32_0 = arith.constant 0 : i32
    %c0_i32_1 = arith.constant 0 : i32
    return %c0_i32, %c0_i32_0 : i32, i32
  }
  func.func @transform_5(%arg0: i32, %arg1: i32) -> (i32, i32, i32) {
    %c0_i32 = arith.constant 0 : i32
    %c0_i32_0 = arith.constant 0 : i32
    return %arg0, %c0_i32, %arg1 : i32, i32, i32
  }
}

</mosaic_0001>

<bundles_post_ra>
// kernel: model_builder_forward.2
= control target key start
LH: loop header
LB: loop body
LE: loop exit
PB: predicated region body
PF: predicated region fallthrough
CT: control target
= control target key end

     0   :  { %s646_s18 = smov 0   ;;  %s648_s19 = smov 0   ;;  %s709_s0 = inlined_call_operand.vmem [shape: bf16[2,36,64], index: 0, kind: input, shape index: {}]   ;;  %s710_s1 = inlined_call_operand.vmem [shape: bf16[32,36], index: 1, kind: input, shape index: {}]   ;;  %s711_s2 = inlined_call_operand.vmem [shape: f32[32,1], index: 2, kind: input, shape index: {}]   ;;  %s712_s3 = inlined_call_operand.vmem [shape: bf16[8,32], index: 3, kind: input, shape index: {}]   ;;  %s713_s4 = inlined_call_operand.vmem [shape: f32[8,1], index: 4, kind: input, shape index: {}]   ;;  %s714_s5 = inlined_call_operand.vmem [shape: bf16[2,8,64], index: 5, kind: output, shape index: {}]  }
   0x1   :  { %s650_s20 = smov 0  }
   0x2 LB: > { %s27_s21 = sadd.s32 1, %s607_s19  ;;  %p514_p0 = scmp.ge.s32.totalorder %s611_s20, 1  ;;  %s611_s20 = sphi %s650_s20, %s15_s20   ;;  %s607_s19 = sphi %s648_s19, %s716_s19   ;;  %s603_s18 = sphi %s646_s18, %s715_s18  }
   0x3   : > { %p29_p1 = scmp.ge.s32.totalorder %s27_s21, 2  ;;  %p206_p2 = scmp.lt.s32.totalorder %s611_s20, 3 }
   0x5   : > { %s718_s21 = smov (%p29_p1, %s27_s21), 0  ;;  %p207_p3 = pnand %p514_p0, %p206_p2 }
   0x6   : > { %p239_p4 = scmp.lt.s32.totalorder (!%p207_p3), %s603_s18, 1 }
   0x7   : > { %210 = sbr.rel (%p207_p3) target bundleno = 438 (0x1b6), region = 40 }
   0xc   : > { %v587_v0 = vld [vmem:[%s710_s1] sm:$0xff]   ;;  %vm313_vm0 = vcmask 293888   ;;  %s720_s18 = smov (!%p239_p4, %s603_s18), 1  ;;  %v266_v1 = vld [vmem:[%s711_s2 + $0x10] sm:$0xff]  ;;  %v613_v2 = vmov 0   ;;  %v267_v4 = vld [vmem:[%s711_s2 + $0x18] sm:$0xff] }
   0xd   : > { %541 = vmatprep.mubr.msk.bf16.mxu0 %vm313_vm0, %v587_v0  ;;  %582 = vset.pattern.permute.xlu0 %v613_v2  ;;  %v264_v3 = vld [vmem:[%s711_s2] sm:$0xff]  ;;  %s554_s28 = smul.u32 20, %s720_s18  ;;  %vm320_vm1 = vcmask 1041408   ;;  %v265_v5 = vld [vmem:[%s711_s2 + $0x8] sm:$0xff]  ;;  %v614_v12 = vmov 0.0   ;;  %vm615_vm2 = vmmov 0  }
   0xe   : > { %280 = vperm.xlu0 %582, %v266_v1   ;;  %583 = vset.pattern.permute.xlu1 %v613_v2  ;;  %v380_v9 = vld [vmem:[%s713_s4] sm:$0xff]  ;;  %v588_v11 = vld [vmem:[%s710_s1 + $0x8] sm:$0xff]   ;;  %vm386_vm3 = vcmask 261120   ;;  %s516_s17 = sshll.u32 %s720_s18, 2  ;;  %vm431_vm4 = vcmask 519168  }
   0xf   : > { %270 = vperm.xlu1 %583, %v264_v3   ;;  %s246_s8 = scalar_lea.vmem %s709_s0, %s554_s28  ;;  %545 = vmatprep.subr.bf16.mxu1 %v614_v12  ;;  %v379_v31 = vld [vmem:[%s712_s3] sm:$0xf]  ;;  %s253_s24 = scalar_lea.vmem %s714_s5, %s516_s17 }
  0x10   : > { %v584_v6 = vld [vmem:[%s246_s8 + $0x10] ss:$0 sps:$4 sm:$0x33]   ;;  %v585_v7 = vld [vmem:[%s246_s8 + $0x8] sm:$0xff]   ;;  %v586_v10 = vld [vmem:[%s246_s8] sm:$0xff]   ;;  %549 = vmatprep.mubr.msk.bf16.mxu1 %vm615_vm2, %v614_v12 }
  0x11   : > { %553 = vmatprep.subr.msk.bf16.mxu0 %vm320_vm1, %v584_v6  ;;  %v322_v8 = vsel %vm320_vm1, %v584_v6, 0 }
  0x12   : > { %285 = vperm.xlu0 %582, %v267_v4   ;;  %536 = vmatpush3.bf16.msra.mxu0 %v322_v8 }
  0x13   : > { %275 = vperm.xlu1 %583, %v265_v5   ;;  %537 = vmatprep.subr.bf16.mxu0 %v585_v7 }
  0x16   : > { %383 = vperm.xlu0 %582, %v380_v9   ;;  %538 = vmatpush3.bf16.msra.mxu0 %v585_v7 }
  0x17   : > { %539 = vmatprep.subr.bf16.mxu0 %v586_v10 }
  0x1a   : > { %540 = vmatpush3.bf16.msra.mxu0 %v586_v10 }
  0x1d   : > { %542 = vmatmul.mubr.msk.bf16.vlgmr.msra.gmra.mxu0 %vm313_vm0, %v588_v11 }
  0x89   : > { %v281_v13 = vpop.permute.xlu0 %280 }
  0x8a   : > { %v271_v14 = vpop.permute.xlu1 %270 }
  0x8d   : > { %v286_v18 = vpop.permute.xlu0 %285 }
  0x8e   : > { %v276_v21 = vpop.permute.xlu1 %275 }
  0x91   : > { %v384_v32 = vpop.permute.xlu0 %383 }
  0xdd   : > { %v543_v15 = vpop.f32.mrf.mxu0 }
  0xde   : > { %v367_v17 = vadd.f32 %v543_v15, %v281_v13 }
  0xdf   : > { %v358_v16 = vpop.f32.mrf.mxu0 }
  0xe0   : > { %v375_v23 = vmax.f32 %v367_v17, 0.0  ;;  %v359_v24 = vadd.f32 %v358_v16, %v271_v14 }
  0xe1   : > { %v544_v19 = vpop.f32.mrf.mxu0 }
  0xe2   : > { %v370_v20 = vadd.f32 %v544_v19, %v286_v18  ;;  %v373_v29 = vmax.f32 %v359_v24, 0.0 }
  0xe3   : > { %v361_v22 = vpop.f32.mrf.mxu0 }
  0xe4   : > { %v376_v25 = vmax.f32 %v370_v20, 0.0  ;;  %v362_v26 = vadd.f32 %v361_v22, %v276_v21 }
  0xe6   : > { %v374_v27 = vmax.f32 %v362_v26, 0.0  ;;  %v378_v28 = vpack.c.bf16 %v376_v25, %v375_v23 }
  0xe8   : > { %546 = vmatpush3.bf16.msra.mxu1 %v378_v28  ;;  %v377_v30 = vpack.c.bf16 %v374_v27, %v373_v29 }
  0xe9   : > { %547 = vmatprep.subr.bf16.mxu1 %v614_v12 }
  0xec   : > { %548 = vmatpush3.bf16.msra.mxu1 %v377_v30 }
  0xef   : > { %550 = vmatmul.mubr.msk.bf16.vlgmr.msra.gmra.mxu1 %vm386_vm3, %v379_v31 }
 0x1af   : > { %v424_v33 = vpop.f32.mrf.mxu1 }
 0x1b0   : > { %v425_v34 = vadd.f32 %v424_v33, %v384_v32 }
 0x1b1   : > { %v551_v35 = vpop.f32.mrf.mxu1 }
 0x1b2   : > { %v430_v36 = vpack.c.bf16 %v425_v34, %v425_v34 }
 0x1b3   : > { %v427_v37 = vpop.f32.mrf.mxu1 }
 0x1b4   : > { %432 = vst.msk [vmem:[%s253_s24] sm:$0xf] %vm431_vm4, %v430_v36 }
 0x1b5   : > { %v552_v38 = vpop.f32.mrf.mxu1 }
 0x1b6 PF: > { %s15_s20 = sadd.s32 1, %s611_s20   ;;  %s715_s18 = smov %s607_s19 }
 0x1b7   : > { %p12_p5 = scmp.ge.s32.totalorder %s15_s20, 4   ;;  %s716_s19 = smov %s718_s21 }
 0x1b9   :  { %14 = sbr.rel (!%p12_p5) target bundleno = 2 (0x2), region = 70 }

// kernel: model_builder_forward.3
= control target key start
LH: loop header
LB: loop body
LE: loop exit
PB: predicated region body
PF: predicated region fallthrough
CT: control target
= control target key end

     0   :  { %8 = vsyncpa [#allocation3], 0  ;;  %s830_s0 = inlined_call_operand.vmem [shape: bf16[2,8,8,8], index: 0, kind: input, shape index: {}]   ;;  %s831_s1 = inlined_call_operand.vmem [shape: bf16[16,8], index: 1, kind: input, shape index: {}]   ;;  %s832_s2 = inlined_call_operand.vmem [shape: bf16[8,16], index: 2, kind: input, shape index: {}]   ;;  %s833_s3 = inlined_call_operand.hbm [shape: f32[2,8,16,16], index: 3, kind: output, shape index: {}]  }
   0x1   :  { %10 = vsyncpa [#allocation3 + $0x1], 0  ;;  %s685_s12 = smov 0   ;;  %s687_s13 = smov 0  }
   0x2   :  { %s689_s14 = smov 0   ;;  %s691_s15 = smov 0  }
   0x3   :  { %s693_s16 = smov 0   ;;  %s695_s17 = smov 0  }
   0x4   :  { %s697_s18 = smov 0   ;;  %s699_s19 = smov 0  }
   0x5 LB: > { %s456_s20 = sadd.s32 4294967295, %s658_s19   ;;  %s457_s21 = sadd.s32 4294967294, %s658_s19   ;;  %s658_s19 = sphi %s699_s19, %s16_s19   ;;  %s654_s18 = sphi %s697_s18, %s842_s18   ;;  %s650_s17 = sphi %s695_s17, %s841_s17   ;;  %s646_s16 = sphi %s693_s16, %s840_s16   ;;  %s642_s15 = sphi %s691_s15, %s839_s15   ;;  %s638_s14 = sphi %s689_s14, %s838_s14   ;;  %s634_s13 = sphi %s687_s13, %s837_s13   ;;  %s630_s12 = sphi %s685_s12, %s836_s12  }
   0x6   : > { %s31_s22 = sadd.s32 1, %s650_s17  ;;  %s35_s23 = sadd.s32 1, %s654_s18 }
   0x7   : > { %p33_p0 = scmp.ge.s32.totalorder %s31_s22, 8  ;;  %p131_p1 = scmp.ne.s32.totalorder %s638_s14, %s634_s13 }
   0x8   : > { %p132_p2 = scmp.eq.s32.totalorder %s456_s20, 15  ;;  %p137_p5 = scmp.ne.s32.totalorder %s634_s13, %s630_s12 }
   0x9   : > { %s844_s22 = smov (%p33_p0, %s31_s22), 0  ;;  %s846_s23 = smov (!%p33_p0, %s35_s23), %s654_s18 }
   0xa   : > { %s115_s24 = ssub.s32 %s650_s17, %s844_s22  ;;  %p736_p3 = por %p132_p2, %p131_p1 }
   0xb   : > { %p37_p4 = scmp.ge.s32.totalorder %s846_s23, 2  ;;  %p138_p6 = scmp.eq.s32.totalorder %s457_s21, 15 }
   0xc   : > { %p461_p7 = scmp.ge.s32.totalorder %s658_s19, 1  ;;  %p179_p9 = scmp.lt.s32.totalorder %s658_s19, 17 }
   0xd   : > { %s848_s23 = smov (%p37_p4, %s846_s23), 0  ;;  %p745_p8 = por %p138_p6, %p137_p5 }
   0xe   : > { %s114_s27 = ssub.s32 %s654_s18, %s848_s23  ;;  %s121_s28 = sadd.s32 1, %s638_s14 }
   0xf   : > { %s116_s29 = sor.u32 %s115_s24, %s114_s27  ;;  %p180_p10 = pnand %p461_p7, %p179_p9 }
  0x10   : > { %p119_p11 = scmp.eq.s32.totalorder %s116_s29, 0  ;;  %p211_p12 = scmp.lt.s32.totalorder (!%p180_p10), %s646_s16, 1 }
  0x11   : > { %183 = sbr.rel (%p180_p10) target bundleno = 444 (0x1bc), region = 32  ;;  %p213_p13 = scmp.lt.s32.totalorder (!%p180_p10), %s642_s15, 7 }
  0x12   : > { %s754_s30 = scalar_select %p119_p11, %s638_s14, %s121_s28  }
  0x13   : > { %s208_s28 = sand.u32 (!%p180_p10), 1, %s634_s13   ;;  %s469_s29 = sshll.u32 (!%p180_p10), %s642_s15, 1 }
  0x14   : > { %s662_s21 = smov (!%p180_p10), [#allocation2]  }
  0x15   : > { %s570_s24 = sshll.u32 (!%p180_p10), %s662_s21, 4  ;;  %s571_s24 = int_to_ptr.vmem [resolvable:$false] %s570_s24 }
  0x16   : > { %v660_v0 = vmov 0.0   ;;  %vm661_vm0 = vmmov 0   ;;  %s212_s4 = scalar_select %p211_p12, %s646_s16, 1  ;;  %vm239_vm1 = vcmask 1043456   ;;  %v565_v3 = vld [vmem:[%s831_s1] sm:$0xff]   ;;  %vm235_vm2 = vcmask 64512  }
  0x17   : > { %478 = vmatprep.subr.bf16.mxu0 %v660_v0  ;;  %480 = vmatprep.mubr.msk.bf16.mxu0 %vm661_vm0, %v660_v0  ;;  %s214_s5 = scalar_select %p213_p13, %s642_s15, 7  ;;  %v285_v4 = vld [vmem:[%s832_s2] sm:$0xf]  ;;  %vm333_vm3 = vcmask 130048  }
  0x18   : > { %484 = vmatprep.subr.bf16.mxu1 %v660_v0  ;;  %486 = vmatprep.mubr.msk.bf16.mxu1 %vm661_vm0, %v660_v0  ;;  %s463_s6 = sshll.u32 %s212_s4, 3  ;;  %v290_v5 = vsel %vm239_vm1, %v285_v4, 0  ;;  %s470_s4 = sshll.u32 %s646_s16, 4 }
  0x19   : > { %s216_s7 = sadd.s32 %s463_s6, %s214_s5  ;;  %485 = vmatpush3.bf16.msra.mxu1 %v290_v5  ;;  %s462_s5 = sshll.u32 %s208_s28, 4 }
  0x1a   : > { %s464_s8 = sshll.u32 %s216_s7, 2  ;;  %s351_s6 = sadd.s32 %s470_s4, %s469_s29 }
  0x1b   : > { %s218_s11 = scalar_lea.vmem %s830_s0, %s464_s8  ;;  %s210_s7 = scalar_lea.vmem [#allocation2], %s462_s5 }
  0x1c   : > { %v229_v1 = vld [vmem:[%s218_s11] sm:$0xf]  ;;  %s354_s8 = sshll.u32 %s210_s7, 4  ;;  %s471_s9 = sshll.u32 %s351_s6, 7  ;;  %s772_s8 = int_to_ptr.vmem [resolvable:$true] %s354_s8 }
  0x1d   : > { %v241_v2 = vsel %vm239_vm1, %v229_v1, 0  ;;  %s777_s15 = scalar_lea.hbm %s833_s3, %s471_s9  ;;  %s779_s16 = scalar_lea.sflag [#allocation3], %s208_s28 }
  0x1e   : > { %479 = vmatpush3.bf16.msra.mxu0 %v241_v2  ;;  %s566_s20 = scalar_lea.vmem %s772_s8, 256  ;;  %s572_s27 = scalar_lea.vmem %s571_s24, 512 }
  0x1f   : > { %p567_p0 = scmp.ne.s32.totalorder %s772_s8, %s566_s20  ;;  %p573_p4 = scmp.lt.s32.totalorder %s772_s8, %s571_s24 }
  0x20   : > { %p574_p5 = scmp.lt.s32.totalorder %s572_s27, %s566_s20 }
  0x21   : > { %481 = vmatmul.mubr.msk.bf16.vlgmr.msra.gmra.mxu0 %vm235_vm2, %v565_v3  ;;  %p568_p1 = pnand %p567_p0, %p736_p3 }
  0x22   : > { %p575_p6 = por %p574_p5, %p573_p4 }
  0x23   : > { %p569_p2 = pneg %p568_p1 }
  0x25   : > { %p576_p7 = pnand %p575_p6, %p569_p2 }
  0xe1   : > { %v277_v6 = vpop.f32.mrf.mxu0 }
  0xe3   : > { %v482_v7 = vpop.f32.mrf.mxu0 }
  0xe5   : > { %v280_v8 = vpop.f32.mrf.mxu0 }
  0xe6   : > { %v284_v9 = vpack.c.bf16 %v280_v8, %v277_v6 }
  0xe7   : > { %v483_v10 = vpop.f32.mrf.mxu0 }
  0xe8   : > { %487 = vmatmul.mubr.msk.bf16.vlgmr.msra.gmra.mxu1 %vm235_vm2, %v284_v9 }
 0x1a8   : > { %v326_v11 = vpop.f32.mrf.mxu1 }
 0x1a9   : > { %334 = vst.msk [vmem:[%s210_s7] sm:$0xff] %vm333_vm3, %v326_v11 }
 0x1aa   : > { %v488_v12 = vpop.f32.mrf.mxu1 }
 0x1ac   : > { %v329_v13 = vpop.f32.mrf.mxu1 }
 0x1ad   : > { %335 = vst.msk [vmem:[%s210_s7 + $0x8] sm:$0xff] %vm333_vm3, %v329_v13 }
 0x1ae   : > { %v489_v14 = vpop.f32.mrf.mxu1 }
 0x1af   : > { %579 = shalt.err (!%p576_p7)
}
 0x1b0   : > { %s580_s28 = scalar_lea.hbm %s777_s15, 256  ;;  %s584_s5 = scalar_lea.hbm %s833_s3, 4096 }
 0x1b1   : > { %p581_p9 = scmp.ne.s32.totalorder %s777_s15, %s580_s28  ;;  %p585_p12 = scmp.lt.s32.totalorder %s777_s15, %s833_s3 }
 0x1b2   : > { %p586_p13 = scmp.lt.s32.totalorder %s584_s5, %s580_s28 }
 0x1b3   : > { %p582_p10 = pnand %p581_p9, %p736_p3 }
 0x1b4   : > { %p587_p0 = por %p586_p13, %p585_p12 }
 0x1b5   : > { %p583_p11 = pneg %p582_p10 }
 0x1b7   : > { %p588_p1 = pnand %p587_p0, %p583_p11 }
 0x1b9   : > { %591 = shalt.err (!%p588_p1)
}
 0x1ba   : > { %s663_s9 = smov 128   ;;  %s664_s10 = smov 8  }
 0x1bb   : > { %490 = dma.vmem_to_hbm [thread:$0]  (%p736_p3), %s772_s8, 256, %s777_s15, %s779_s16, %s663_s9, %s663_s9, %s664_s10  }
 0x1bc PF: > { %p496_p2 = scmp.ge.s32.totalorder %s658_s19, 2  ;;  %s369_s11 = sand.u32 1, %s630_s12  }
 0x1bd   : > { %s370_s20 = scalar_lea.sflag [#allocation3], %s369_s11 }
 0x1be   : > { %p493_p4 = pnand %p496_p2, %p745_p8 }
 0x1c0   : > { %p494_p5 = pneg %p493_p4 }
 0x1c2   : > { %625 = dma.done.wait (%p494_p5), %s370_s20, 256  }
 0x1c3   : > { %627 = vsyncadd (%p494_p5), %s370_s20, 4294967040  ;;  %s16_s19 = sadd.s32 1, %s658_s19   ;;  %s836_s12 = smov %s634_s13 }
 0x1c4   : > { %p13_p6 = scmp.ge.s32.totalorder %s16_s19, 18   ;;  %s837_s13 = smov %s638_s14 }
 0x1c5   : > { %s838_s14 = smov %s754_s30  ;;  %s839_s15 = smov %s650_s17 }
 0x1c6   : > { %s840_s16 = smov %s654_s18  ;;  %s841_s17 = smov %s844_s22 }
 0x1c7   : > { %s842_s18 = smov %s848_s23  ;;  %15 = sbr.rel (!%p13_p6) target bundleno = 5 (0x5), region = 70 }
 0x1cc   :  { %375 = vsyncpa [#allocation3], 1 }
 0x1cd   :  { %377 = vsyncpa [#allocation3 + $0x1], 1 }

</bundles_post_ra>
